<compile_context>
chip_gen: v7x
topology: tpu7x:2x2x1
jax: 0.10.0
libtpu: 0.0.40
codegen_flags: <defaults>
</compile_context>

<pallas_src>
import functools

import jax
import jax.numpy as jnp
from jax.experimental import pallas as pl
from jax.experimental.pallas import tpu as pltpu


def _round_up(x, m):
    return ((x + m - 1) // m) * m


def _choose_tn(n, hw, c, itemsize, budget_bytes=12 << 20):
    """Largest batch tile (multiple of 8, power-of-2 growth) whose
    double-buffered x tile fits the VMEM budget on all generations."""
    if n <= 8:
        return n  # single block along N (block extent == full extent)
    tn = 8
    while (tn * 2 <= 128 and tn * 2 <= n
           and 2 * (tn * 2) * hw * c * itemsize <= budget_bytes):
        tn *= 2
    return tn


def global_head_kernel(p_ref, x_ref, w_ref, b_ref, o_ref, *, pow_dtype):
    # p_ref: (1,) f32 in SMEM (trainable GeM exponent)
    # x_ref: (TN, HW, C) native dtype in VMEM
    # w_ref: (C, NC_PAD) f32; b_ref: (1, NC_PAD) f32
    # o_ref: (TN, NC_PAD) f32
    eps = 1e-6
    p = p_ref[0]

    # clamp(min=eps).pow(p): x is strictly positive after the clamp, so
    # x**p == exp(p * log(x)); both transcendentals run on the EUP slot.
    # pow_dtype=bfloat16 roughly doubles EUP throughput on v6e/v7x
    # (keep f32 on v5e — no bf16 EUP there).
    x = x_ref[...].astype(pow_dtype)
    xc = jnp.maximum(x, jnp.asarray(eps, pow_dtype))
    xp = jnp.exp(p.astype(pow_dtype) * jnp.log(xc))

    # adaptive_avg_pool2d(1x1) == mean over the spatial (sublane) axis.
    # HW is never tiled, so the block mean divides by the true spatial size.
    pooled = jnp.mean(xp.astype(jnp.float32), axis=-2)          # (TN, C) f32
    # .pow(1/p): pooled >= eps**p > 0, so the log is safe.
    pooled = jnp.exp((1.0 / p) * jnp.log(pooled))

    # fc: (TN, C) @ (C, NC_PAD) + b — LHS is already lane-dense.
    out = jnp.dot(pooled, w_ref[...], preferred_element_type=jnp.float32)
    o_ref[...] = (out + b_ref[...]).astype(o_ref.dtype)


def global_head(x_nchw, p, w_t, b, *, pow_dtype=jnp.float32):
    """GlobalHead forward.

    x_nchw: (N, C, H, W) activations (any float dtype, e.g. bf16).
    p:      (1,) trainable GeM exponent.
    w_t:    (C, nc) — transposed torch fc weight.
    b:      (nc,) fc bias.
    Returns (N, nc) float32.
    """
    N, C, H, W = x_nchw.shape
    HW = H * W
    nc = w_t.shape[1]

    # Layout: (N, HW, C) — C on lanes, HW on sublanes. Keep x in its native
    # dtype; the kernel casts after the (cheaper) load.
    # TODO(synk): in a real pipeline the producer should emit NHWC directly so
    # this transpose is free.
    x3 = jnp.transpose(x_nchw.reshape(N, C, HW), (0, 2, 1))      # (N, HW, C)

    # Pad the FC output lane width to a multiple of 128 -> unmasked stores.
    nc_pad = _round_up(nc, 128)
    w_pad = jnp.zeros((C, nc_pad), jnp.float32).at[:, :nc].set(w_t.astype(jnp.float32))
    b_pad = jnp.zeros((1, nc_pad), jnp.float32).at[0, :nc].set(b.astype(jnp.float32))

    # Batch tiling: double-buffered x tile stays well under scoped VMEM on
    # v5e (16 MiB default) / v6e (32 MiB) / v7x (32 of 64 MiB physical).
    tn = _choose_tn(N, HW, C, jnp.dtype(x3.dtype).itemsize)
    n_pad = _round_up(N, tn)
    if n_pad != N:
        x3 = jnp.pad(x3, ((0, n_pad - N), (0, 0), (0, 0)))

    kernel = functools.partial(global_head_kernel, pow_dtype=pow_dtype)

    out = pl.pallas_call(
        kernel,
        out_shape=jax.ShapeDtypeStruct((n_pad, nc_pad), jnp.float32),
        grid=(n_pad // tn,),
        in_specs=[
            pl.BlockSpec(memory_space=pltpu.MemorySpace.SMEM),      # p (scalar)
            pl.BlockSpec((tn, HW, C), lambda i: (i, 0, 0)),         # x tile
            pl.BlockSpec((C, nc_pad), lambda i: (0, 0)),            # w^T (resident)
            pl.BlockSpec((1, nc_pad), lambda i: (0, 0)),            # b   (resident)
        ],
        out_specs=pl.BlockSpec((tn, nc_pad), lambda i: (i, 0)),
        compiler_params=pltpu.CompilerParams(
            dimension_semantics=("parallel",),      # megacore sharding on v7x
            vmem_limit_bytes=64 << 20,
        ),
    )(p.astype(jnp.float32), x3, w_pad, b_pad)

    return out[:N, :nc]


def reference_global_head(x_nchw, p, w_t, b):
    """Pure-JAX reference mirroring the PyTorch forward."""
    eps = 1e-6
    pv = p[0]
    xc = jnp.maximum(x_nchw.astype(jnp.float32), eps)
    xp = xc ** pv
    pooled = jnp.mean(xp, axis=(2, 3)) ** (1.0 / pv)   # (N, C)
    return pooled @ w_t.astype(jnp.float32) + b[None, :].astype(jnp.float32)


if __name__ == "__main__":
    # Small shapes consistent with the module: N=2, C(w_in)=4, H=W=16, nc=8
    N, C, H, W = 2, 4, 16, 16
    NC_OUT = 8

    key = jax.random.PRNGKey(0)
    kx, kw, kb = jax.random.split(key, 3)

    x = jax.random.normal(kx, (N, C, H, W), dtype=jnp.float32)
    # nn.Linear(w_in, nc): weight (nc, w_in), bias (nc,). Pass weight transposed.
    w_torch_style = jax.random.normal(kw, (NC_OUT, C), dtype=jnp.float32) * 0.1
    b = jax.random.normal(kb, (NC_OUT,), dtype=jnp.float32) * 0.1
    w_t = w_torch_style.T                         # (C, nc)
    p = jnp.ones((1,), dtype=jnp.float32) * 3.0   # GeneralizedMeanPoolingP init norm=3

    out = jax.block_until_ready(global_head(x, p, w_t, b))

    ref = reference_global_head(x, p, w_t, b)
    assert out.shape == (N, NC_OUT)
    assert jnp.allclose(out, ref, atol=1e-4, rtol=1e-4), (out, ref)

    print("KERNEL_OK")
</pallas_src>

<mosaic_0001>
module attributes {stable_mosaic.version = 11 : i64} {
  func.func @global_head_kernel(%arg0: i32, %arg1: memref<1xf32, #tpu.memory_space<smem>>, %arg2: memref<2x256x4xf32, #tpu.memory_space<vmem>>, %arg3: memref<4x128xf32, #tpu.memory_space<vmem>>, %arg4: memref<1x128xf32, #tpu.memory_space<vmem>>, %arg5: memref<2x128xf32, #tpu.memory_space<vmem>>) attributes {dimension_semantics = [#tpu.dimension_semantics<parallel>], iteration_bounds = array<i64: 1>, scalar_prefetch = 0 : i64, scratch_operands = 0 : i64, tpu.core_type = #tpu.core_type<tc>, window_params = [{transform_indices = @transform_0, window_bounds = array<i64: 1>}, {transform_indices = @transform_1, window_bounds = array<i64: 2, 256, 4>}, {pipeline_mode = #tpu.pipeline_mode<synchronous>, transform_indices = @transform_2, window_bounds = array<i64: 4, 128>}, {pipeline_mode = #tpu.pipeline_mode<synchronous>, transform_indices = @transform_3, window_bounds = array<i64: 1, 128>}, {transform_indices = @transform_4, window_bounds = array<i64: 2, 128>}]} {
    %c0 = arith.constant 0 : index
    %0 = memref.load %arg1[%c0] : memref<1xf32, #tpu.memory_space<smem>>
    %c0_0 = arith.constant 0 : index
    %c0_1 = arith.constant 0 : index
    %c0_2 = arith.constant 0 : index
    %1 = vector.load %arg2[%c0_0, %c0_1, %c0_2] : memref<2x256x4xf32, #tpu.memory_space<vmem>>, vector<2x256x4xf32>
    %cst = arith.constant 9.99999997E-7 : f32
    %2 = vector.broadcast %cst : f32 to vector<2x256x4xf32>
    %3 = arith.maximumf %1, %2 : vector<2x256x4xf32>
    %4 = math.log %3 : vector<2x256x4xf32>
    %5 = vector.broadcast %0 : f32 to vector<2x256x4xf32>
    %6 = arith.mulf %5, %4 : vector<2x256x4xf32>
    %7 = math.exp %6 : vector<2x256x4xf32>
    %cst_3 = arith.constant dense<0.000000e+00> : vector<2x4xf32>
    %8 = vector.multi_reduction <add>, %7, %cst_3 [1] : vector<2x256x4xf32> to vector<2x4xf32>
    %cst_4 = arith.constant 2.560000e+02 : f32
    %9 = vector.broadcast %cst_4 : f32 to vector<2x4xf32>
    %10 = arith.divf %8, %9 : vector<2x4xf32>
    %cst_5 = arith.constant 1.000000e+00 : f32
    %11 = arith.divf %cst_5, %0 : f32
    %12 = math.log %10 : vector<2x4xf32>
    %13 = vector.broadcast %11 : f32 to vector<2x4xf32>
    %14 = arith.mulf %13, %12 : vector<2x4xf32>
    %15 = math.exp %14 : vector<2x4xf32>
    %c0_6 = arith.constant 0 : index
    %c0_7 = arith.constant 0 : index
    %16 = vector.load %arg3[%c0_6, %c0_7] : memref<4x128xf32, #tpu.memory_space<vmem>>, vector<4x128xf32>
    %cst_8 = arith.constant dense<0.000000e+00> : vector<2x128xf32>
    %17 = tpu.matmul %15, %16, %cst_8 {dimension_numbers = #tpu.dot_dimension_numbers<[1], [0], [0], [1], [0, 0, 1, 1], [], []>} : vector<2x4xf32>, vector<4x128xf32>, vector<2x128xf32> -> vector<2x128xf32>
    %c0_9 = arith.constant 0 : index
    %c0_10 = arith.constant 0 : index
    %18 = vector.load %arg4[%c0_9, %c0_10] : memref<1x128xf32, #tpu.memory_space<vmem>>, vector<1x128xf32>
    %19 = vector.broadcast %18 : vector<1x128xf32> to vector<2x128xf32>
    %20 = arith.addf %17, %19 : vector<2x128xf32>
    %c0_11 = arith.constant 0 : index
    %c0_12 = arith.constant 0 : index
    %21 = vector.load %arg5[%c0_11, %c0_12] : memref<2x128xf32, #tpu.memory_space<vmem>>, vector<2x128xf32>
    tpu.vector_store %arg5[%c0_11, %c0_12], %20 {strides = array<i32>} : memref<2x128xf32, #tpu.memory_space<vmem>>, vector<2x128xf32>,
    return
  }
  func.func @transform_0(%arg0: i32) -> i32 {
    %c0_i32 = arith.constant 0 : i32
    %c0_i32_0 = arith.constant 0 : i32
    return %c0_i32 : i32
  }
  func.func @transform_1(%arg0: i32) -> (i32, i32, i32) {
    %c0_i32 = arith.constant 0 : i32
    %c0_i32_0 = arith.constant 0 : i32
    %c0_i32_1 = arith.constant 0 : i32
    return %arg0, %c0_i32, %c0_i32_0 : i32, i32, i32
  }
  func.func @transform_2(%arg0: i32) -> (i32, i32) {
    %c0_i32 = arith.constant 0 : i32
    %c0_i32_0 = arith.constant 0 : i32
    %c0_i32_1 = arith.constant 0 : i32
    return %c0_i32, %c0_i32_0 : i32, i32
  }
  func.func @transform_3(%arg0: i32) -> (i32, i32) {
    %c0_i32 = arith.constant 0 : i32
    %c0_i32_0 = arith.constant 0 : i32
    %c0_i32_1 = arith.constant 0 : i32
    return %c0_i32, %c0_i32_0 : i32, i32
  }
  func.func @transform_4(%arg0: i32) -> (i32, i32) {
    %c0_i32 = arith.constant 0 : i32
    %c0_i32_0 = arith.constant 0 : i32
    return %arg0, %c0_i32 : i32, i32
  }
}

</mosaic_0001>

<bundles_post_ra>
// kernel: tpu_custom_call.1
= control target key start
LH: loop header
LB: loop body
LE: loop exit
PB: predicated region body
PF: predicated region fallthrough
CT: control target
= control target key end

     0   :  { %10 = vsyncpa [#allocation4], 0  ;;  %s1920_s0 = inlined_call_operand.<no memory space> [shape: f32[1], index: 0, kind: input, shape index: {}]   ;;  %s1921_s1 = inlined_call_operand.hbm [shape: f32[2,256,4], index: 1, kind: input, shape index: {}]   ;;  %s1922_s2 = inlined_call_operand.hbm [shape: f32[4,128], index: 2, kind: input, shape index: {}]   ;;  %s1923_s3 = inlined_call_operand.hbm [shape: f32[1,128], index: 3, kind: input, shape index: {}]   ;;  %s1924_s4 = inlined_call_operand.hbm [shape: f32[2,128], index: 4, kind: output, shape index: {}]  }
   0x1   :  { %11 = vsyncpa [#allocation7], 0 }
   0x2   :  { %12 = vsyncpa [#allocation5], 0  ;;  %s1147_s15 = smov [#allocation6]   ;;  %s1148_s17 = smov [#allocation3]  }
   0x3   :  { %s33_s16 = sshll.u32 %s1147_s15, 4  ;;  %s20_s18 = sshll.u32 %s1148_s17, 4  ;;  %s34_s16 = int_to_ptr.vmem [resolvable:$true] %s33_s16  ;;  %s1180_s18 = int_to_ptr.vmem [resolvable:$true] %s20_s18 }
   0x4   :  { %s1053_s21 = scalar_lea.hbm %s1922_s2, 64 }
   0x5   :  { %p1054_p0 = scmp.ne.s32.totalorder %s1922_s2, %s1053_s21  ;;  %p1057_p1 = scmp.lt.u32.totalorder %s1053_s21, %s1922_s2 }
   0x7   :  { %p1059_p2 = pnand %p1057_p1, %p1054_p0 }
   0x9   :  { %1062 = shalt.err (!%p1059_p2)
}
   0xa   :  { %s1063_s26 = scalar_lea.vmem %s34_s16, 64  ;;  %p1068_p4 = scmp.lt.s32.totalorder %s34_s16, %s34_s16 }
   0xb   :  { %p1064_p3 = scmp.ne.s32.totalorder %s34_s16, %s1063_s26  ;;  %p1069_p5 = scmp.lt.s32.totalorder %s1063_s26, %s1063_s26 }
   0xd   :  { %p1070_p6 = por %p1069_p5, %p1068_p4 }
   0xf   :  { %p1071_p7 = pnand %p1070_p6, %p1064_p3 }
  0x11   :  { %1074 = shalt.err (!%p1071_p7)
}
  0x12   :  { %36 = dma.hbm_to_vmem [thread:$0]  %s1922_s2, 64, %s34_s16, [#allocation7]  }
  0x13   :  { %s1075_s5 = scalar_lea.hbm %s1921_s1, 8192 }
  0x14   :  { %p1076_p8 = scmp.ne.s32.totalorder %s1921_s1, %s1075_s5  ;;  %p1079_p9 = scmp.lt.u32.totalorder %s1075_s5, %s1921_s1 }
  0x16   :  { %p1081_p10 = pnand %p1079_p9, %p1076_p8 }
  0x18   :  { %1084 = shalt.err (!%p1081_p10)
}
  0x19   :  { %s1085_s10 = scalar_lea.vmem %s1180_s18, 8192  ;;  %p1090_p12 = scmp.lt.s32.totalorder %s1180_s18, %s1180_s18 }
  0x1a   :  { %p1086_p11 = scmp.ne.s32.totalorder %s1180_s18, %s1085_s10  ;;  %p1091_p13 = scmp.lt.s32.totalorder %s1085_s10, %s1085_s10 }
  0x1c   :  { %p1092_p0 = por %p1091_p13, %p1090_p12 }
  0x1e   :  { %p1093_p1 = pnand %p1092_p0, %p1086_p11 }
  0x20   :  { %1096 = shalt.err (!%p1093_p1)
}
  0x21   :  { %s1149_s2 = smov 128   ;;  %s1150_s11 = smov 8  }
  0x22   :  { %26 = dma.hbm_to_vmem [thread:$0]  %s1921_s1, 8192, %s1180_s18, [#allocation4], %s1149_s2, %s1149_s2, %s1150_s11  }
  0x23   :  { %s1151_s14 = smov [#allocation8]   ;;  %s1097_s19 = scalar_lea.hbm %s1923_s3, 16 }
  0x24   :  { %s43_s15 = sshll.u32 %s1151_s14, 4  ;;  %p1098_p2 = scmp.ne.s32.totalorder %s1923_s3, %s1097_s19  ;;  %s44_s15 = int_to_ptr.vmem [resolvable:$true] %s43_s15 }
  0x25   :  { %p1101_p3 = scmp.lt.u32.totalorder %s1097_s19, %s1923_s3 }
  0x27   :  { %p1103_p4 = pnand %p1101_p3, %p1098_p2 }
  0x29   :  { %1106 = shalt.err (!%p1103_p4)
}
  0x2a   :  { %s1107_s24 = scalar_lea.vmem %s44_s15, 16  ;;  %s1111_s1 = scalar_lea.vmem %s44_s15, 32 }
  0x2b   :  { %p1108_p5 = scmp.ne.s32.totalorder %s44_s15, %s1107_s24  ;;  %p1112_p6 = scmp.lt.s32.totalorder %s44_s15, %s44_s15 }
  0x2c   :  { %p1113_p7 = scmp.lt.s32.totalorder %s1111_s1, %s1107_s24 }
  0x2e   :  { %p1114_p8 = por %p1113_p7, %p1112_p6 }
  0x30   :  { %p1115_p9 = pnand %p1114_p8, %p1108_p5 }
  0x32   :  { %1118 = shalt.err (!%p1115_p9)
}
  0x33   :  { %46 = dma.hbm_to_vmem [thread:$0]  %s1923_s3, 16, %s44_s15, [#allocation7]  }
  0x34   :  { %1141 = dma.done.wait [#allocation4], 8192  }
  0x35   :  { %1142 = vsyncadd [#allocation4], 4294959104 }
  0x36   :  { %1143 = dma.done.wait [#allocation7], 80  }
  0x37   :  { %1144 = vsyncadd [#allocation7], 4294967216  ;;  %v1226_v0 = vstv %s1920_s0  ;;  %v57_v2 = vld [vmem:[#allocation3] sm:$0xff]  ;;  %v58_v3 = vld [vmem:[#allocation3 + $0x8] sm:$0xff]  ;;  %vm506_vm0 = vcmask 31744   ;;  %vm676_vm1 = vcmask 1043456  }
  0x38   :  { %1930 = vst [vmem:[#allocation13_spill] sm:$0xff] %v1226_v0  ;;  %787 = vrcp.f32 %v1226_v0  ;;  %v59_v4 = vld [vmem:[#allocation3 + $0x10] sm:$0xff]  ;;  %v60_v5 = vld [vmem:[#allocation3 + $0x18] sm:$0xff]  ;;  %v121_v6 = vmax.f32 %v57_v2, 1e-06  ;;  %v61_v7 = vld [vmem:[#allocation3 + $0x20] sm:$0xff] }
  0x39   :  { %v122_v8 = vmax.f32 %v58_v3, 1e-06  ;;  %v62_v9 = vld [vmem:[#allocation3 + $0x28] sm:$0xff]  ;;  %v123_v10 = vmax.f32 %v59_v4, 1e-06  ;;  %v63_v11 = vld [vmem:[#allocation3 + $0x30] sm:$0xff] }
  0x3a   :  { %v124_v12 = vmax.f32 %v60_v5, 1e-06  ;;  %v64_v13 = vld [vmem:[#allocation3 + $0x38] sm:$0xff]  ;;  %v125_v14 = vmax.f32 %v61_v7, 1e-06  ;;  %789 = vlog2.f32 %v121_v6  ;;  %v65_v15 = vld [vmem:[#allocation3 + $0x40] sm:$0xff] }
  0x3b   :  { %v126_v16 = vmax.f32 %v62_v9, 1e-06  ;;  %791 = vlog2.f32 %v122_v8  ;;  %v66_v17 = vld [vmem:[#allocation3 + $0x48] sm:$0xff]  ;;  %v127_v18 = vmax.f32 %v63_v11, 1e-06  ;;  %v67_v19 = vld [vmem:[#allocation3 + $0x50] sm:$0xff] }
  0x3c   :  { %793 = vlog2.f32 %v123_v10  ;;  %v128_v20 = vmax.f32 %v64_v13, 1e-06  ;;  %v68_v21 = vld [vmem:[#allocation3 + $0x58] sm:$0xff]  ;;  %v129_v22 = vmax.f32 %v65_v15, 1e-06  ;;  %v69_v23 = vld [vmem:[#allocation3 + $0x60] sm:$0xff] }
  0x3d   :  { %795 = vlog2.f32 %v124_v12  ;;  %v130_v24 = vmax.f32 %v66_v17, 1e-06  ;;  %v70_v25 = vld [vmem:[#allocation3 + $0x68] sm:$0xff]  ;;  %v131_v26 = vmax.f32 %v67_v19, 1e-06  ;;  %v71_v27 = vld [vmem:[#allocation3 + $0x70] sm:$0xff] }
  0x3e   :  { %797 = vlog2.f32 %v125_v14  ;;  %v132_v28 = vmax.f32 %v68_v21, 1e-06  ;;  %v72_v29 = vld [vmem:[#allocation3 + $0x78] sm:$0xff]  ;;  %v133_v30 = vmax.f32 %v69_v23, 1e-06  ;;  %v73_v31 = vld [vmem:[#allocation3 + $0x80] sm:$0xff] }
  0x3f   :  { %799 = vlog2.f32 %v126_v16  ;;  %v134_v32 = vmax.f32 %v70_v25, 1e-06  ;;  %v74_v34 = vld [vmem:[#allocation3 + $0x88] sm:$0xff]  ;;  %v135_v35 = vmax.f32 %v71_v27, 1e-06  ;;  %v75_v37 = vld [vmem:[#allocation3 + $0x90] sm:$0xff] }
  0x40   :  { %801 = vlog2.f32 %v127_v18  ;;  %v136_v38 = vmax.f32 %v72_v29, 1e-06  ;;  %v76_v40 = vld [vmem:[#allocation3 + $0x98] sm:$0xff]  ;;  %v137_v41 = vmax.f32 %v73_v31, 1e-06  ;;  %v77_v43 = vld [vmem:[#allocation3 + $0xa0] sm:$0xff] }
  0x41   :  { %803 = vlog2.f32 %v128_v20  ;;  %v138_v44 = vmax.f32 %v74_v34, 1e-06  ;;  %v78_v46 = vld [vmem:[#allocation3 + $0xa8] sm:$0xff]  ;;  %v139_v47 = vmax.f32 %v75_v37, 1e-06  ;;  %v79_v49 = vld [vmem:[#allocation3 + $0xb0] sm:$0xff] }
  0x42   :  { %v788_v1 = vpop.eup %787  ;;  %805 = vlog2.f32 %v129_v22  ;;  %v140_v50 = vmax.f32 %v76_v40, 1e-06  ;;  %v80_v52 = vld [vmem:[#allocation3 + $0xb8] sm:$0xff]  ;;  %v141_v53 = vmax.f32 %v77_v43, 1e-06  ;;  %v81_v55 = vld [vmem:[#allocation3 + $0xc0] sm:$0xff] }
  0x43   :  { %777 = vpush %v788_v1  ;;  %807 = vlog2.f32 %v130_v24  ;;  %v142_v56 = vmax.f32 %v78_v46, 1e-06  ;;  %v82_v58 = vld [vmem:[#allocation3 + $0xc8] sm:$0xff]  ;;  %v143_v59 = vmax.f32 %v79_v49, 1e-06  ;;  %v83_v61 = vld [vmem:[#allocation3 + $0xd0] sm:$0xff] }
  0x44   :  { %v1229_v33 = vpop.eup %789  ;;  %809 = vlog2.f32 %v131_v26  ;;  %v144_v62 = vmax.f32 %v80_v52, 1e-06  ;;  %v84_v1 = vld [vmem:[#allocation3 + $0xd8] sm:$0xff]  ;;  %v85_v2 = vld [vmem:[#allocation3 + $0xe0] sm:$0xff]  ;;  %v145_v3 = vmax.f32 %v81_v55, 1e-06 }
  0x45   :  { %v1231_v36 = vpop.eup %791  ;;  %811 = vlog2.f32 %v132_v28  ;;  %v86_v5 = vld [vmem:[#allocation3 + $0xe8] sm:$0xff]  ;;  %v1253_v6 = vld [vmem:[#allocation3 + $0xf0] sm:$0xff]  ;;  %v1255_v7 = vld [vmem:[#allocation3 + $0xf8] sm:$0xff]  ;;  %v146_v8 = vmax.f32 %v82_v58, 1e-06  ;;  %vm1153_vm2 = vmmov 0  }
  0x46   :  { %v1233_v39 = vpop.eup %793  ;;  %813 = vlog2.f32 %v133_v30  ;;  %v1259_v10 = vld [vmem:[#allocation3 + $0x100] sm:$0xff]  ;;  %v1261_v11 = vld [vmem:[#allocation3 + $0x108] sm:$0xff]  ;;  %v1263_v12 = vld [vmem:[#allocation3 + $0x110] sm:$0xff]  ;;  %v147_v13 = vmax.f32 %v83_v61, 1e-06  ;;  %vm672_vm3 = vcmask 1041409  }
  0x47   :  { %v1235_v42 = vpop.eup %795  ;;  %815 = vlog2.f32 %v134_v32  ;;  %v1267_v15 = vld [vmem:[#allocation3 + $0x118] sm:$0xff]  ;;  %v1269_v16 = vld [vmem:[#allocation3 + $0x120] sm:$0xff]  ;;  %v1271_v17 = vld [vmem:[#allocation3 + $0x128] sm:$0xff]  ;;  %v148_v18 = vmax.f32 %v84_v1, 1e-06  ;;  %s1154_s3 = smov [#allocation9]  }
  0x48   :  { %v1237_v45 = vpop.eup %797  ;;  %817 = vlog2.f32 %v135_v35  ;;  %v1275_v20 = vld [vmem:[#allocation3 + $0x130] sm:$0xff]  ;;  %v1277_v21 = vld [vmem:[#allocation3 + $0x138] sm:$0xff]  ;;  %v1279_v22 = vld [vmem:[#allocation3 + $0x140] sm:$0xff]  ;;  %v149_v23 = vmax.f32 %v85_v2, 1e-06  ;;  %s757_s28 = sshll.u32 %s1154_s3, 4  ;;  %s758_s28 = int_to_ptr.vmem [resolvable:$true] %s757_s28 }
  0x49   :  { %v1239_v48 = vpop.eup %799  ;;  %819 = vlog2.f32 %v136_v38  ;;  %v1283_v25 = vld [vmem:[#allocation3 + $0x148] sm:$0xff]  ;;  %v1285_v26 = vld [vmem:[#allocation3 + $0x150] sm:$0xff]  ;;  %v1287_v27 = vld [vmem:[#allocation3 + $0x158] sm:$0xff]  ;;  %v150_v28 = vmax.f32 %v86_v5, 1e-06  ;;  %s1119_s29 = scalar_lea.vmem %s758_s28, 32  ;;  %p1124_p11 = scmp.lt.s32.totalorder %s758_s28, %s758_s28 }
  0x4a   :  { %v1241_v51 = vpop.eup %801  ;;  %821 = vlog2.f32 %v137_v41  ;;  %v1291_v30 = vld [vmem:[#allocation3 + $0x160] sm:$0xff]  ;;  %v1293_v31 = vld [vmem:[#allocation3 + $0x168] sm:$0xff]  ;;  %v1295_v32 = vld [vmem:[#allocation3 + $0x170] sm:$0xff]  ;;  %v151_v34 = vmax.f32 %v1253_v6, 1e-06  ;;  %p1120_p10 = scmp.ne.s32.totalorder %s758_s28, %s1119_s29  ;;  %p1125_p12 = scmp.lt.s32.totalorder %s1119_s29, %s1119_s29 }
  0x4b   :  { %v1243_v54 = vpop.eup %803  ;;  %823 = vlog2.f32 %v138_v44  ;;  %1931 = vst [vmem:[#allocation14_spill] sm:$0xff] %v1295_v32  ;;  %v152_v35 = vmax.f32 %v1255_v7, 1e-06  ;;  %v1301_v38 = vld [vmem:[#allocation3 + $0x178] sm:$0xff]  ;;  %v1303_v40 = vld [vmem:[#allocation3 + $0x180] sm:$0xff]  ;;  %v1305_v41 = vld [vmem:[#allocation3 + $0x188] sm:$0xff] }
  0x4c   :  { %v1245_v57 = vpop.eup %805  ;;  %825 = vlog2.f32 %v139_v47  ;;  %v153_v43 = vmax.f32 %v1259_v10, 1e-06  ;;  %v154_v44 = vmax.f32 %v1261_v11, 1e-06  ;;  %v155_v46 = vmax.f32 %v1263_v12, 1e-06  ;;  %p1126_p13 = por %p1125_p12, %p1124_p11 }
  0x4d   :  { %v1247_v60 = vpop.eup %807  ;;  %827 = vlog2.f32 %v140_v50  ;;  %v1312_v49 = vld [vmem:[#allocation3 + $0x190] sm:$0xff]  ;;  %v1314_v50 = vld [vmem:[#allocation3 + $0x198] sm:$0xff]  ;;  %v1316_v52 = vld [vmem:[#allocation3 + $0x1a0] sm:$0xff]  ;;  %v157_v55 = vmax.f32 %v1269_v16, 1e-06 }
  0x4e   :  { %v1249_v63 = vpop.eup %809  ;;  %829 = vlog2.f32 %v141_v53  ;;  %v156_v53 = vmax.f32 %v1267_v15, 1e-06  ;;  %v1325_v61 = vld [vmem:[#allocation3 + $0x1b0] sm:$0xff]  ;;  %v159_v1 = vmax.f32 %v1275_v20, 1e-06  ;;  %v1334_v6 = vld [vmem:[#allocation3 + $0x1c0] sm:$0xff]  ;;  %p1127_p0 = pnand %p1126_p13, %p1120_p10 }
  0x4f   :  { %v1251_v4 = vpop.eup %811  ;;  %831 = vlog2.f32 %v142_v56  ;;  %v158_v56 = vmax.f32 %v1271_v17, 1e-06  ;;  %v160_v2 = vmax.f32 %v1277_v21, 1e-06  ;;  %v1336_v7 = vld [vmem:[#allocation3 + $0x1c8] sm:$0xff]  ;;  %v1345_v15 = vld [vmem:[#allocation3 + $0x1d8] sm:$0xff] }
  0x50   :  { %v1257_v9 = vpop.eup %813  ;;  %833 = vlog2.f32 %v143_v59  ;;  %v1323_v59 = vld [vmem:[#allocation3 + $0x1a8] sm:$0xff]  ;;  %v162_v10 = vmax.f32 %v1283_v25, 1e-06  ;;  %v1347_v16 = vld [vmem:[#allocation3 + $0x1e0] sm:$0xff]  ;;  %v1356_v25 = vld [vmem:[#allocation3 + $0x1f0] sm:$0xff] }
  0x51   :  { %v1265_v14 = vpop.eup %815  ;;  %835 = vlog2.f32 %v144_v62  ;;  %v1327_v62 = vld [vmem:[#allocation3 + $0x1b8] sm:$0xff]  ;;  %v1349_v17 = vld [vmem:[#allocation3 + $0x1e8] sm:$0xff]  ;;  %1932 = vst [vmem:[#allocation15_spill] sm:$0xff] %v1356_v25  ;;  %v186_v11 = vmul.f32 0.6931472, %v1229_v33 }
  0x52   :  { %v1273_v19 = vpop.eup %817  ;;  %837 = vlog2.f32 %v145_v3  ;;  %v194_v0 = vmul.f32 0.6931472, %v1237_v45  ;;  %v1387_v33 = vmul.f32 0.6931472, %v1243_v54 }
  0x53   :  { %v1281_v24 = vpop.eup %819  ;;  %839 = vlog2.f32 %v146_v8  ;;  %v1338_v8 = vld [vmem:[#allocation3 + $0x1d0] sm:$0xff] }
  0x54   :  { %v1289_v29 = vpop.eup %821  ;;  %841 = vlog2.f32 %v147_v13 }
  0x55   :  { %v1299_v37 = vpop.eup %823  ;;  %843 = vlog2.f32 %v148_v18  ;;  %v188_v18 = vmul.f32 0.6931472, %v1231_v36  ;;  %v1390_v36 = vmul.f32 0.6931472, %v1245_v57  ;;  %v1407_v57 = vmul.f32 0.6931472, %v1265_v14 }
  0x56   :  { %v1310_v47 = vpop.eup %825  ;;  %845 = vlog2.f32 %v149_v23  ;;  %v1936_v14 = vmax.f32 %v1287_v27, 1e-06 }
  0x57   :  { %v1321_v58 = vpop.eup %827  ;;  %847 = vlog2.f32 %v150_v28  ;;  %v1358_v28 = vld [vmem:[#allocation3 + $0x1f8] sm:$0xff] }
  0x58   :  { %v1332_v5 = vpop.eup %829  ;;  %849 = vlog2.f32 %v151_v34  ;;  %1933 = vst [vmem:[#allocation16_spill] sm:$0xff] %v1358_v28  ;;  %v1384_v34 = vmul.f32 0.6931472, %v1241_v51  ;;  %v1401_v51 = vmul.f32 0.6931472, %v1251_v4 }
  0x59   :  { %v1343_v13 = vpop.eup %831  ;;  %851 = vlog2.f32 %v152_v35  ;;  %v192_v35 = vmul.f32 0.6931472, %v1235_v42  ;;  %v1934_v42 = vmax.f32 %v1279_v22, 1e-06  ;;  %v1413_v22 = vmul.f32 0.6931472, %v1281_v24 }
  0x5a   :  { %v1354_v23 = vpop.eup %833  ;;  %853 = vlog2.f32 %v153_v43  ;;  %v1418_v4 = vmul.f32 0.6931472, %v1289_v29  ;;  %v1429_v24 = vmul.f32 0.6931472, %v1321_v58  ;;  %v1937_v29 = vmax.f32 %v1291_v30, 1e-06 }
  0x5b   :  { %v836_v3 = vpop.eup %835  ;;  %855 = vlog2.f32 %v154_v44  ;;  %v1938_v58 = vmax.f32 %v1293_v31, 1e-06  ;;  %v1939_v30 = vld [vmem:[#allocation14_spill] sm:$0xff]  ;;  %v1941_v31 = vmax.f32 %v1301_v38, 1e-06 }
  0x5c   :  { %v838_v21 = vpop.eup %837  ;;  %857 = vlog2.f32 %v155_v46 }
  0x5d   :  { %v840_v12 = vpop.eup %839  ;;  %859 = vlog2.f32 %v156_v53  ;;  %v190_v53 = vmul.f32 0.6931472, %v1233_v39  ;;  %v1393_v39 = vmul.f32 0.6931472, %v1247_v60  ;;  %v1410_v60 = vmul.f32 0.6931472, %v1273_v19 }
  0x5e   :  { %v842_v20 = vpop.eup %841  ;;  %861 = vlog2.f32 %v157_v55  ;;  %v196_v55 = vmul.f32 0.6931472, %v1239_v48  ;;  %v1398_v48 = vmul.f32 0.6931472, %v1249_v63  ;;  %v1935_v63 = vmax.f32 %v1285_v26, 1e-06 }
  0x5f   :  { %v844_v32 = vpop.eup %843  ;;  %863 = vlog2.f32 %v158_v56  ;;  %v1404_v56 = vmul.f32 0.6931472, %v1257_v9  ;;  %v1421_v9 = vmul.f32 0.6931472, %v1299_v37  ;;  %v1432_v26 = vmul.f32 0.6931472, %v1332_v5 }
  0x60   :  { %v846_v43 = vpop.eup %845  ;;  %865 = vlog2.f32 %v159_v1  ;;  %v1444_v27 = vmul.f32 0.6931472, %v838_v21  ;;  %v1448_v5 = vmul.f32 0.6931472, %v840_v12 }
  0x61   :  { %v848_v44 = vpop.eup %847  ;;  %867 = vlog2.f32 %v160_v2  ;;  %v1424_v2 = vmul.f32 0.6931472, %v1310_v47  ;;  %v1440_v47 = vmul.f32 0.6931472, %v1354_v23  ;;  %v1456_v23 = vmul.f32 0.6931472, %v846_v43 }
  0x62   :  { %v850_v46 = vpop.eup %849  ;;  %869 = vlog2.f32 %v1934_v42  ;;  %v1442_v42 = vmul.f32 0.6931472, %v836_v3  ;;  %v1458_v3 = vmul.f32 0.6931472, %v848_v44  ;;  %v1943_v44 = vmax.f32 %v1305_v41, 1e-06 }
  0x63   :  { %v852_v45 = vpop.eup %851  ;;  %871 = vlog2.f32 %v162_v10  ;;  %v1435_v10 = vmul.f32 0.6931472, %v1343_v13  ;;  %v1452_v13 = vmul.f32 0.6931472, %v844_v32  ;;  %v1460_v21 = vmul.f32 0.6931472, %v850_v46 }
  0x64   :  { %v854_v54 = vpop.eup %853  ;;  %873 = vlog2.f32 %v1935_v63  ;;  %v1464_v12 = vmul.f32 0.6931472, %v852_v45  ;;  %v1944_v46 = vld [vmem:[#allocation13_spill] sm:$0xff]  ;;  %v1946_v41 = vmax.f32 %v1314_v50, 1e-06 }
  0x65   :  { %v856_v1 = vpop.eup %855  ;;  %875 = vlog2.f32 %v1936_v14  ;;  %v1450_v14 = vmul.f32 0.6931472, %v842_v20  ;;  %v1466_v20 = vmul.f32 0.6931472, %v854_v54  ;;  %v314_v25 = vmul.f32 %v1944_v46, %v186_v11 }
  0x66   :  { %v858_v19 = vpop.eup %857  ;;  %877 = vlog2.f32 %v1937_v29  ;;  %v1940_v29 = vmax.f32 %v1939_v30, 1e-06  ;;  %v1468_v32 = vmul.f32 0.6931472, %v856_v1  ;;  %v1942_v30 = vmax.f32 %v1303_v40, 1e-06 }
  0x67   :  { %v860_v37 = vpop.eup %859  ;;  %879 = vlog2.f32 %v1938_v58  ;;  %v1472_v43 = vmul.f32 0.6931472, %v858_v19  ;;  %v315_v38 = vmul.f32 %v1944_v46, %v188_v18  ;;  %v1945_v54 = vmax.f32 %v1312_v49, 1e-06 }
  0x68   :  { %v862_v63 = vpop.eup %861  ;;  %881 = vlog2.f32 %v1940_v29  ;;  %v1478_v45 = vmul.f32 0.6931472, %v860_v37  ;;  %v316_v1 = vmul.f32 %v1944_v46, %v190_v53  ;;  %v317_v40 = vmul.f32 %v1944_v46, %v192_v35 }
  0x69   :  { %v864_v28 = vpop.eup %863  ;;  %883 = vlog2.f32 %v1941_v31  ;;  %v1484_v19 = vmul.f32 0.6931472, %v862_v63  ;;  %v318_v11 = vmul.f32 %v1944_v46, %v194_v0  ;;  %v1490_v18 = vmul.f32 %v1944_v46, %v196_v55 }
  0x6a   :  { %v866_v58 = vpop.eup %865  ;;  %885 = vlog2.f32 %v1942_v30  ;;  %v1947_v49 = vmax.f32 %v1316_v52, 1e-06  ;;  %v1498_v35 = vmul.f32 %v1944_v46, %v1384_v34  ;;  %v1502_v53 = vmul.f32 %v1944_v46, %v1387_v33 }
  0x6b   :  { %v868_v29 = vpop.eup %867  ;;  %887 = vlog2.f32 %v1943_v44  ;;  %v1492_v44 = vmul.f32 0.6931472, %v864_v28  ;;  %v1504_v63 = vmul.f32 0.6931472, %v866_v58  ;;  %v1948_v0 = vmax.f32 %v1323_v59, 1e-06 }
  0x6c   :  { %v870_v31 = vpop.eup %869  ;;  %889 = vlog2.f32 %v1945_v54  ;;  %v1510_v28 = vmul.f32 %v1944_v46, %v1390_v36  ;;  %v1514_v52 = vmul.f32 %v1944_v46, %v1393_v39  ;;  %v1516_v55 = vmul.f32 0.6931472, %v868_v29 }
  0x6d   :  { %v872_v30 = vpop.eup %871  ;;  %891 = vlog2.f32 %v1946_v41  ;;  %v1949_v33 = vmax.f32 %v1325_v61, 1e-06  ;;  %v1522_v58 = vmul.f32 %v1944_v46, %v1398_v48  ;;  %v1526_v59 = vmul.f32 %v1944_v46, %v1401_v51 }
  0x6e   :  { %v874_v37 = vpop.eup %873  ;;  %893 = vlog2.f32 %v1947_v49  ;;  %v1528_v54 = vmul.f32 0.6931472, %v870_v31  ;;  %v1950_v39 = vmax.f32 %v1327_v62, 1e-06  ;;  %v1534_v29 = vmul.f32 %v1944_v46, %v1404_v56 }
  0x6f   :  { %v876_v50 = vpop.eup %875  ;;  %895 = vlog2.f32 %v1948_v0  ;;  %v1538_v61 = vmul.f32 %v1944_v46, %v1407_v57  ;;  %v1951_v41 = vmax.f32 %v1334_v6, 1e-06  ;;  %v1544_v51 = vmul.f32 %v1944_v46, %v1410_v60 }
  0x70   :  { %v878_v34 = vpop.eup %877  ;;  %897 = vlog2.f32 %v1949_v33  ;;  %v1548_v62 = vmul.f32 %v1944_v46, %v1413_v22  ;;  %v378_v31 = vmul.f32 1.442695, %v314_v25  ;;  %v1550_v56 = vmul.f32 0.6931472, %v872_v30 }
  0x71   :  { %v880_v36 = vpop.eup %879  ;;  %899 = vlog2.f32 %v1950_v39  ;;  %v1952_v0 = vmax.f32 %v1336_v7, 1e-06  ;;  %v1556_v57 = vmul.f32 %v1944_v46, %v1418_v4  ;;  %v380_v6 = vmul.f32 1.442695, %v315_v38 }
  0x72   :  { %v882_v48 = vpop.eup %881  ;;  %901 = vlog2.f32 %v1951_v41  ;;  %v1558_v39 = vmul.f32 0.6931472, %v874_v37  ;;  %v1953_v60 = vmax.f32 %v1338_v8, 1e-06  ;;  %v1564_v25 = vmul.f32 %v1944_v46, %v1421_v9 }
  0x73   :  { %v884_v49 = vpop.eup %883  ;;  %903 = vlog2.f32 %v1952_v0  ;;  %v382_v22 = vmul.f32 1.442695, %v316_v1  ;;  %v1566_v41 = vmul.f32 0.6931472, %v876_v50  ;;  %v1954_v7 = vmax.f32 %v1345_v15, 1e-06 }
  0x74   :  { %v886_v33 = vpop.eup %885  ;;  %905 = vlog2.f32 %v1953_v60  ;;  %v1572_v4 = vmul.f32 %v1944_v46, %v1424_v2  ;;  %v1576_v38 = vmul.f32 %v1944_v46, %v1429_v24  ;;  %v1580_v9 = vmul.f32 %v1944_v46, %v1432_v26  ;;  %s778_s0 = spop %777 }
  0x75   :  { %v888_v30 = vpop.eup %887  ;;  %907 = vlog2.f32 %v1954_v7  ;;  %v1584_v1 = vmul.f32 %v1944_v46, %v1435_v10  ;;  %v384_v15 = vmul.f32 1.442695, %v317_v40  ;;  %v1586_v50 = vmul.f32 0.6931472, %v878_v34  ;;  %v1958_v7 = vld [vmem:[#allocation15_spill] sm:$0xff] }
  0x76   :  { %v890_v8 = vpop.eup %889  ;;  %909 = vpow2.f32 %v378_v31  ;;  %v1590_v2 = vmul.f32 %v1944_v46, %v1440_v47  ;;  %v1594_v24 = vmul.f32 %v1944_v46, %v1442_v42  ;;  %v276_v0 = vmul.f32 0.6931472, %v880_v36 }
  0x77   :  { %v892_v37 = vpop.eup %891  ;;  %911 = vpow2.f32 %v380_v6  ;;  %v1598_v10 = vmul.f32 %v1944_v46, %v1444_v27  ;;  %v386_v40 = vmul.f32 1.442695, %v318_v11  ;;  %v1600_v34 = vmul.f32 0.6931472, %v882_v48 }
  0x78   :  { %v894_v26 = vpop.eup %893  ;;  %913 = vpow2.f32 %v382_v22  ;;  %v1955_v60 = vmax.f32 %v1347_v16, 1e-06  ;;  %v1606_v47 = vmul.f32 %v1944_v46, %v1448_v5  ;;  %v1610_v42 = vmul.f32 %v1944_v46, %v1450_v14 }
  0x79   :  { %v896_v31 = vpop.eup %895  ;;  %v1612_v27 = vmul.f32 0.6931472, %v884_v49  ;;  %v1616_v11 = vmul.f32 %v1944_v46, %v1452_v13  ;;  %v388_v16 = vmul.f32 1.442695, %v1490_v18  ;;  %v1619_v6 = vmul.f32 0.6931472, %v886_v33 }
  0x7a   :  { %915 = vlog2.f32 %v1955_v60  ;;  %v898_v36 = vpop.eup %897  ;;  %v1956_v5 = vmax.f32 %v1349_v17, 1e-06  ;;  %v1625_v14 = vmul.f32 %v1944_v46, %v1456_v23  ;;  %v1629_v49 = vmul.f32 %v1944_v46, %v1458_v3 }
  0x7b   :  { %917 = vpow2.f32 %v384_v15  ;;  %v900_v48 = vpop.eup %899  ;;  %v1635_v13 = vmul.f32 %v1944_v46, %v1460_v21  ;;  %v1639_v18 = vmul.f32 %v1944_v46, %v1464_v12  ;;  %v390_v17 = vmul.f32 1.442695, %v1498_v35 }
  0x7c   :  { %919 = vlog2.f32 %v1956_v5  ;;  %v1631_v22 = vpop.eup %901  ;;  %v1644_v23 = vmul.f32 0.6931472, %v888_v30  ;;  %v1959_v3 = vmax.f32 %v1958_v7, 1e-06  ;;  %v346_v15 = vmul.f32 %v1944_v46, %v1466_v20  ;;  %v1961_v20 = vld [vmem:[#allocation16_spill] sm:$0xff] }
  0x7d   :  { %1957 = vst [vmem:[#allocation14_spill] sm:$0xff] %v1639_v18  ;;  %921 = vpow2.f32 %v386_v40  ;;  %v1642_v33 = vpop.eup %903  ;;  %v1652_v21 = vmul.f32 %v1944_v46, %v1468_v32  ;;  %v1656_v12 = vmul.f32 0.6931472, %v890_v8  ;;  %v1660_v35 = vmul.f32 %v1944_v46, %v1472_v43 }
  0x7e   :  { %923 = vlog2.f32 %v1959_v3  ;;  %v1654_v60 = vpop.eup %905  ;;  %v392_v30 = vmul.f32 1.442695, %v1502_v53  ;;  %v1665_v5 = vmul.f32 0.6931472, %v892_v37  ;;  %v1962_v7 = vmax.f32 %v1961_v20, 1e-06 }
  0x7f   :  { %925 = vpow2.f32 %v388_v16  ;;  %v1663_v40 = vpop.eup %907  ;;  %v1671_v32 = vmul.f32 %v1944_v46, %v1478_v45  ;;  %v1675_v8 = vmul.f32 %v1944_v46, %v1484_v19  ;;  %v1677_v3 = vmul.f32 0.6931472, %v894_v26 }
  0x80   :  { %1960 = vst [vmem:[#allocation13_spill] sm:$0xff] %v1663_v40  ;;  %927 = vlog2.f32 %v1962_v7  ;;  %v910_v43 = vpop.eup %909  ;;  %v1681_v53 = vmul.f32 %v1944_v46, %v1492_v44  ;;  %v394_v37 = vmul.f32 1.442695, %v1510_v28  ;;  %v1684_v20 = vmul.f32 0.6931472, %v896_v31 }
  0x81   :  { %929 = vpow2.f32 %v390_v17  ;;  %v912_v16 = vpop.eup %911  ;;  %v1688_v45 = vmul.f32 %v1944_v46, %v1504_v63  ;;  %v1692_v19 = vmul.f32 %v1944_v46, %v1516_v55  ;;  %v1696_v26 = vmul.f32 %v1944_v46, %v1528_v54 }
  0x82   :  { %v914_v44 = vpop.eup %913  ;;  %v1700_v17 = vmul.f32 %v1944_v46, %v1550_v56  ;;  %v1704_v28 = vmul.f32 %v1944_v46, %v1558_v39  ;;  %931 = vpow2.f32 %v392_v30  ;;  %v396_v63 = vmul.f32 1.442695, %v1514_v52 }
  0x83   :  { %v1709_v55 = vmul.f32 0.6931472, %v898_v36  ;;  %v1713_v54 = vmul.f32 %v1944_v46, %v1566_v41  ;;  %v1717_v7 = vmul.f32 %v1944_v46, %v1586_v50  ;;  %v398_v56 = vmul.f32 1.442695, %v1522_v58 }
  0x84   :  { %v1707_v31 = vpop.eup %915  ;;  %v1721_v39 = vmul.f32 %v1944_v46, %v276_v0  ;;  %933 = vpow2.f32 %v394_v37  ;;  %v400_v52 = vmul.f32 1.442695, %v1526_v59  ;;  %v507_v36 = vsel %vm506_vm0, %v910_v43, 0.0 }
  0x85   :  { %1963 = vst [vmem:[#allocation15_spill] sm:$0xff] %v1707_v31  ;;  %v918_v40 = vpop.eup %917  ;;  %v1727_v31 = vmul.f32 0.6931472, %v900_v48  ;;  %v402_v41 = vmul.f32 1.442695, %v1534_v29  ;;  %v508_v50 = vsel %vm506_vm0, %v912_v16, 0.0  ;;  %v1734_v0 = vmul.f32 %v1944_v46, %v1600_v34 }
  0x86   :  { %v1725_v30 = vpop.eup %919  ;;  %v510_v18 = vsel %vm506_vm0, %v914_v44, 0.0  ;;  %935 = vpow2.f32 %v396_v63  ;;  %v404_v59 = vmul.f32 1.442695, %v1538_v61  ;;  %v509_v37 = vadd.f32 %v508_v50, %v507_v36 }
  0x87   :  { %v922_v58 = vpop.eup %921  ;;  %v1741_v48 = vmul.f32 %v1944_v46, %v1612_v27  ;;  %937 = vpow2.f32 %v398_v56  ;;  %v406_v29 = vmul.f32 1.442695, %v1544_v51  ;;  %v512_v16 = vsel %vm506_vm0, %v918_v40, 0.0 }
  0x88   :  { %v1737_v43 = vpop.eup %923  ;;  %v1747_v34 = vmul.f32 %v1944_v46, %v1619_v6  ;;  %939 = vpow2.f32 %v400_v52  ;;  %v408_v61 = vmul.f32 1.442695, %v1548_v62  ;;  %v511_v63 = vadd.f32 %v510_v18, %v509_v37 }
  0x89   :  { %v926_v44 = vpop.eup %925  ;;  %v1753_v50 = vmul.f32 0.6931472, %v1631_v22  ;;  %941 = vpow2.f32 %v402_v41  ;;  %v442_v27 = vmul.f32 1.442695, %v346_v15  ;;  %v514_v51 = vsel %vm506_vm0, %v922_v58, 0.0 }
  0x8a   :  { %v1750_v36 = vpop.eup %927  ;;  %v1758_v40 = vmul.f32 %v1944_v46, %v1644_v23  ;;  %943 = vpow2.f32 %v404_v59  ;;  %v444_v6 = vmul.f32 1.442695, %v1652_v21  ;;  %v513_v52 = vadd.f32 %v512_v16, %v511_v63  ;;  %v662_v21 = vld [vmem:[#allocation6] sm:$0xf] }
  0x8b   :  { %v930_v56 = vpop.eup %929  ;;  %v1763_v62 = vmul.f32 %v1944_v46, %v1656_v12  ;;  %945 = vpow2.f32 %v406_v29  ;;  %v446_v22 = vmul.f32 1.442695, %v1660_v35  ;;  %v516_v18 = vsel %vm506_vm0, %v926_v44, 0.0 }
  0x8c   :  { %v932_v15 = vpop.eup %931  ;;  %v1769_v41 = vmul.f32 %v1944_v46, %v1665_v5  ;;  %947 = vpow2.f32 %v408_v61  ;;  %v448_v23 = vmul.f32 1.442695, %v1671_v32  ;;  %v515_v58 = vadd.f32 %v514_v51, %v513_v52 }
  0x8d   :  { %949 = vpow2.f32 %v442_v27  ;;  %v450_v59 = vmul.f32 1.442695, %v1675_v8  ;;  %v518_v12 = vsel %vm506_vm0, %v930_v56, 0.0  ;;  %v452_v35 = vmul.f32 1.442695, %v1681_v53 }
  0x8e   :  { %v934_v37 = vpop.eup %933  ;;  %951 = vpow2.f32 %v444_v6  ;;  %v517_v29 = vadd.f32 %v516_v18, %v515_v58  ;;  %v1152_v16 = vmov 0.0   ;;  %v410_v5 = vmul.f32 1.442695, %v1556_v57 }
  0x8f   :  { %772 = vmatprep.subr.mxu0 %v1152_v16  ;;  %953 = vpow2.f32 %v446_v22  ;;  %v520_v32 = vsel %vm506_vm0, %v932_v15, 0.0  ;;  %v1778_v61 = vmul.f32 0.6931472, %v1642_v33  ;;  %v454_v8 = vmul.f32 1.442695, %v1688_v45  ;;  %774 = vmatprep.mubr.msk.f32.mxu0 %vm1153_vm2, %v1152_v16 }
  0x90   :  { %773 = vmatpush3.msk.msra.mxu0 %vm676_vm1, %v662_v21  ;;  %v936_v44 = vpop.eup %935  ;;  %955 = vpow2.f32 %v448_v23  ;;  %v519_v63 = vadd.f32 %v518_v12, %v517_v29  ;;  %v1783_v27 = vmul.f32 %v1944_v46, %v1677_v3  ;;  %v412_v57 = vmul.f32 1.442695, %v1564_v25 }
  0x91   :  { %v938_v53 = vpop.eup %937  ;;  %957 = vpow2.f32 %v450_v59  ;;  %v522_v51 = vsel %vm506_vm0, %v934_v37, 0.0  ;;  %v1789_v33 = vmul.f32 %v1944_v46, %v1684_v20  ;;  %v456_v45 = vmul.f32 1.442695, %v1692_v19 }
  0x92   :  { %v940_v56 = vpop.eup %939  ;;  %959 = vpow2.f32 %v452_v35  ;;  %v521_v6 = vadd.f32 %v520_v32, %v519_v63  ;;  %v1794_v22 = vmul.f32 %v1944_v46, %v1709_v55  ;;  %v414_v25 = vmul.f32 1.442695, %v1572_v4 }
  0x93   :  { %v942_v52 = vpop.eup %941  ;;  %961 = vpow2.f32 %v410_v5  ;;  %v524_v3 = vsel %vm506_vm0, %v936_v44, 0.0  ;;  %v1799_v15 = vmul.f32 0.6931472, %v1654_v60  ;;  %v458_v20 = vmul.f32 1.442695, %v1696_v26 }
  0x94   :  { %v944_v18 = vpop.eup %943  ;;  %963 = vpow2.f32 %v454_v8  ;;  %v523_v23 = vadd.f32 %v522_v51, %v521_v6  ;;  %v1804_v58 = vmul.f32 %v1944_v46, %v1727_v31  ;;  %v416_v55 = vmul.f32 1.442695, %v1576_v38 }
  0x95   :  { %v946_v19 = vpop.eup %945  ;;  %965 = vpow2.f32 %v412_v57  ;;  %v526_v4 = vsel %vm506_vm0, %v938_v53, 0.0  ;;  %v1810_v59 = vmul.f32 %v1944_v46, %v1753_v50  ;;  %v460_v60 = vmul.f32 1.442695, %v1700_v17 }
  0x96   :  { %v948_v21 = vpop.eup %947  ;;  %967 = vpow2.f32 %v456_v45  ;;  %v525_v26 = vadd.f32 %v524_v3, %v523_v23  ;;  %v418_v37 = vmul.f32 1.442695, %v1580_v9  ;;  %v420_v31 = vmul.f32 1.442695, %v1584_v1 }
  0x97   :  { %v950_v12 = vpop.eup %949  ;;  %969 = vpow2.f32 %v414_v25  ;;  %v528_v35 = vsel %vm506_vm0, %v940_v56, 0.0  ;;  %v462_v29 = vmul.f32 1.442695, %v1704_v28  ;;  %v464_v17 = vmul.f32 1.442695, %v1713_v54 }
  0x98   :  { %v952_v38 = vpop.eup %951  ;;  %971 = vpow2.f32 %v458_v20  ;;  %v527_v16 = vadd.f32 %v526_v4, %v525_v26  ;;  %v576_v50 = vsel %vm506_vm0, %v950_v12, 0.0  ;;  %v530_v32 = vsel %vm506_vm0, %v942_v52, 0.0 }
  0x99   :  { %v954_v5 = vpop.eup %953  ;;  %973 = vpow2.f32 %v416_v55  ;;  %v577_v44 = vsel %vm506_vm0, %v952_v38, 0.0  ;;  %v422_v28 = vmul.f32 1.442695, %v1590_v2  ;;  %v532_v57 = vsel %vm506_vm0, %v944_v18, 0.0 }
  0x9a   :  { %v956_v9 = vpop.eup %955  ;;  %975 = vpow2.f32 %v460_v60  ;;  %v529_v1 = vadd.f32 %v528_v35, %v527_v16  ;;  %v578_v8 = vadd.f32 %v577_v44, %v576_v50  ;;  %v579_v63 = vsel %vm506_vm0, %v954_v5, 0.0 }
  0x9b   :  { %v958_v53 = vpop.eup %957  ;;  %977 = vpow2.f32 %v418_v37  ;;  %v581_v51 = vsel %vm506_vm0, %v956_v9, 0.0  ;;  %v466_v54 = vmul.f32 1.442695, %v1717_v7  ;;  %v424_v25 = vmul.f32 1.442695, %v1594_v24 }
  0x9c   :  { %v960_v56 = vpop.eup %959  ;;  %979 = vpow2.f32 %v462_v29  ;;  %v531_v45 = vadd.f32 %v530_v32, %v529_v1  ;;  %v580_v6 = vadd.f32 %v579_v63, %v578_v8  ;;  %v534_v3 = vsel %vm506_vm0, %v946_v19, 0.0 }
  0x9d   :  { %v962_v52 = vpop.eup %961  ;;  %981 = vpow2.f32 %v420_v31  ;;  %v583_v20 = vsel %vm506_vm0, %v958_v53, 0.0  ;;  %v468_v2 = vmul.f32 1.442695, %v1721_v39  ;;  %v426_v7 = vmul.f32 1.442695, %v1598_v10 }
  0x9e   :  { %v964_v23 = vpop.eup %963  ;;  %983 = vpow2.f32 %v464_v17  ;;  %v533_v18 = vadd.f32 %v532_v57, %v531_v45  ;;  %v582_v55 = vadd.f32 %v581_v51, %v580_v6  ;;  %v536_v60 = vsel %vm506_vm0, %v948_v21, 0.0 }
  0x9f   :  { %v966_v4 = vpop.eup %965  ;;  %985 = vpow2.f32 %v422_v28  ;;  %v585_v26 = vsel %vm506_vm0, %v960_v56, 0.0  ;;  %v470_v24 = vmul.f32 1.442695, %v1734_v0  ;;  %v428_v39 = vmul.f32 1.442695, %v1606_v47 }
  0xa0   :  { %v968_v12 = vpop.eup %967  ;;  %987 = vpow2.f32 %v466_v54  ;;  %v535_v19 = vadd.f32 %v534_v3, %v533_v18  ;;  %v584_v37 = vadd.f32 %v583_v20, %v582_v55  ;;  %v538_v35 = vsel %vm506_vm0, %v962_v52, 0.0 }
  0xa1   :  { %v970_v31 = vpop.eup %969  ;;  %989 = vpow2.f32 %v424_v25  ;;  %v587_v38 = vsel %vm506_vm0, %v964_v23, 0.0  ;;  %v472_v10 = vmul.f32 1.442695, %v1741_v48  ;;  %v430_v0 = vmul.f32 1.442695, %v1610_v42 }
  0xa2   :  { %v972_v29 = vpop.eup %971  ;;  %991 = vpow2.f32 %v468_v2  ;;  %v537_v21 = vadd.f32 %v536_v60, %v535_v19  ;;  %v586_v16 = vadd.f32 %v585_v26, %v584_v37  ;;  %v540_v5 = vsel %vm506_vm0, %v966_v4, 0.0  ;;  %v1964_v19 = vld [vmem:[#allocation14_spill] sm:$0xff] }
  0xa3   :  { %v974_v50 = vpop.eup %973  ;;  %993 = vpow2.f32 %v426_v7  ;;  %v589_v17 = vsel %vm506_vm0, %v968_v12, 0.0  ;;  %v474_v47 = vmul.f32 1.442695, %v1747_v34  ;;  %v432_v48 = vmul.f32 1.442695, %v1616_v11 }
  0xa4   :  { %v976_v32 = vpop.eup %975  ;;  %995 = vpow2.f32 %v470_v24  ;;  %v539_v44 = vadd.f32 %v538_v35, %v537_v21  ;;  %v588_v9 = vadd.f32 %v587_v38, %v586_v16  ;;  %v542_v8 = vsel %vm506_vm0, %v970_v31, 0.0 }
  0xa5   :  { %v978_v1 = vpop.eup %977  ;;  %997 = vpow2.f32 %v428_v39  ;;  %v591_v63 = vsel %vm506_vm0, %v972_v29, 0.0  ;;  %v476_v42 = vmul.f32 1.442695, %v1758_v40  ;;  %v434_v34 = vmul.f32 1.442695, %v1625_v14 }
  0xa6   :  { %v980_v53 = vpop.eup %979  ;;  %999 = vpow2.f32 %v472_v10  ;;  %v541_v28 = vadd.f32 %v540_v5, %v539_v44  ;;  %v590_v57 = vadd.f32 %v589_v17, %v588_v9  ;;  %v544_v56 = vsel %vm506_vm0, %v974_v50, 0.0  ;;  %v1965_v10 = vld [vmem:[#allocation13_spill] sm:$0xff] }
  0xa7   :  { %v982_v51 = vpop.eup %981  ;;  %1001 = vpow2.f32 %v430_v0  ;;  %v593_v54 = vsel %vm506_vm0, %v976_v32, 0.0  ;;  %v478_v11 = vmul.f32 1.442695, %v1763_v62  ;;  %v436_v40 = vmul.f32 1.442695, %v1629_v49 }
  0xa8   :  { %v984_v45 = vpop.eup %983  ;;  %1003 = vpow2.f32 %v474_v47  ;;  %v543_v6 = vadd.f32 %v542_v8, %v541_v28  ;;  %v592_v52 = vadd.f32 %v591_v63, %v590_v57  ;;  %v546_v3 = vsel %vm506_vm0, %v978_v1, 0.0 }
  0xa9   :  { %v986_v25 = vpop.eup %985  ;;  %1005 = vpow2.f32 %v432_v48  ;;  %v595_v20 = vsel %vm506_vm0, %v980_v53, 0.0  ;;  %v480_v14 = vmul.f32 1.442695, %v1769_v41  ;;  %v438_v62 = vmul.f32 1.442695, %v1635_v13  ;;  %v1966_v53 = vld [vmem:[#allocation15_spill] sm:$0xff] }
  0xaa   :  { %v988_v23 = vpop.eup %987  ;;  %1007 = vpow2.f32 %v476_v42  ;;  %v545_v2 = vadd.f32 %v544_v56, %v543_v6  ;;  %v594_v18 = vadd.f32 %v593_v54, %v592_v52  ;;  %v548_v4 = vsel %vm506_vm0, %v982_v51, 0.0 }
  0xab   :  { %v990_v55 = vpop.eup %989  ;;  %1009 = vpow2.f32 %v434_v34  ;;  %v597_v7 = vsel %vm506_vm0, %v984_v45, 0.0  ;;  %v482_v49 = vmul.f32 1.442695, %v1783_v27  ;;  %v440_v41 = vmul.f32 1.442695, %v1964_v19 }
  0xac   :  { %v992_v60 = vpop.eup %991  ;;  %1011 = vpow2.f32 %v478_v11  ;;  %v547_v26 = vadd.f32 %v546_v3, %v545_v2  ;;  %v596_v12 = vadd.f32 %v595_v20, %v594_v18  ;;  %v550_v37 = vsel %vm506_vm0, %v986_v25, 0.0 }
  0xad   :  { %v994_v24 = vpop.eup %993  ;;  %1013 = vpow2.f32 %v436_v40  ;;  %v599_v31 = vsel %vm506_vm0, %v988_v23, 0.0  ;;  %v484_v13 = vmul.f32 1.442695, %v1789_v33  ;;  %v304_v21 = vmul.f32 0.6931472, %v1965_v10 }
  0xae   :  { %v996_v39 = vpop.eup %995  ;;  %1015 = vpow2.f32 %v480_v14  ;;  %v549_v35 = vadd.f32 %v548_v4, %v547_v26  ;;  %v598_v38 = vadd.f32 %v597_v7, %v596_v12  ;;  %v552_v27 = vsel %vm506_vm0, %v990_v55, 0.0 }
  0xaf   :  { %v998_v29 = vpop.eup %997  ;;  %1017 = vpow2.f32 %v438_v62  ;;  %v601_v16 = vsel %vm506_vm0, %v992_v60, 0.0  ;;  %v486_v0 = vmul.f32 1.442695, %v1794_v22  ;;  %v371_v33 = vmul.f32 %v1944_v46, %v1778_v61 }
  0xb0   :  { %v1000_v50 = vpop.eup %999  ;;  %1019 = vpow2.f32 %v482_v49  ;;  %v551_v5 = vadd.f32 %v550_v37, %v549_v35  ;;  %v600_v17 = vadd.f32 %v599_v31, %v598_v38  ;;  %v554_v47 = vsel %vm506_vm0, %v994_v24, 0.0 }
  0xb1   :  { %v1002_v32 = vpop.eup %1001  ;;  %1021 = vpow2.f32 %v440_v41  ;;  %v603_v44 = vsel %vm506_vm0, %v996_v39, 0.0  ;;  %v488_v1 = vmul.f32 1.442695, %v1804_v58  ;;  %v306_v22 = vmul.f32 0.6931472, %v1966_v53 }
  0xb2   :  { %v1004_v9 = vpop.eup %1003  ;;  %1023 = vpow2.f32 %v484_v13  ;;  %v553_v48 = vadd.f32 %v552_v27, %v551_v5  ;;  %v602_v8 = vadd.f32 %v601_v16, %v600_v17  ;;  %v372_v42 = vmul.f32 %v1944_v46, %v1799_v15 }
  0xb3   :  { %v1006_v63 = vpop.eup %1005  ;;  %v556_v28 = vsel %vm506_vm0, %v998_v29, 0.0  ;;  %v605_v61 = vsel %vm506_vm0, %v1000_v50, 0.0  ;;  %1025 = vpow2.f32 %v486_v0  ;;  %v490_v51 = vmul.f32 1.442695, %v1810_v59 }
  0xb4   :  { %v1008_v57 = vpop.eup %1007  ;;  %v555_v34 = vadd.f32 %v554_v47, %v553_v48  ;;  %v604_v56 = vadd.f32 %v603_v44, %v602_v8  ;;  %v308_v58 = vmul.f32 0.6931472, %v1725_v30  ;;  %v373_v45 = vmul.f32 %v1944_v46, %v304_v21 }
  0xb5   :  { %v1010_v54 = vpop.eup %1009  ;;  %v558_v11 = vsel %vm506_vm0, %v1002_v32, 0.0  ;;  %v607_v6 = vsel %vm506_vm0, %v1004_v9, 0.0  ;;  %1027 = vpow2.f32 %v488_v1  ;;  %v492_v52 = vmul.f32 1.442695, %v371_v33 }
  0xb6   :  { %v1012_v15 = vpop.eup %1011  ;;  %v557_v25 = vadd.f32 %v556_v28, %v555_v34  ;;  %v606_v40 = vadd.f32 %v605_v61, %v604_v56  ;;  %v310_v20 = vmul.f32 0.6931472, %v1737_v43  ;;  %v374_v59 = vmul.f32 %v1944_v46, %v306_v22 }
  0xb7   :  { %v1014_v3 = vpop.eup %1013  ;;  %v560_v23 = vsel %vm506_vm0, %v1006_v63, 0.0  ;;  %v609_v30 = vsel %vm506_vm0, %v1008_v57, 0.0  ;;  %1029 = vpow2.f32 %v490_v51  ;;  %v494_v2 = vmul.f32 1.442695, %v372_v42 }
  0xb8   :  { %v1016_v14 = vpop.eup %1015  ;;  %v559_v18 = vadd.f32 %v558_v11, %v557_v25  ;;  %v608_v55 = vadd.f32 %v607_v6, %v606_v40  ;;  %v312_v4 = vmul.f32 0.6931472, %v1750_v36  ;;  %v375_v7 = vmul.f32 %v1944_v46, %v308_v58 }
  0xb9   :  { %v1018_v62 = vpop.eup %1017  ;;  %v562_v60 = vsel %vm506_vm0, %v1010_v54, 0.0  ;;  %v611_v43 = vsel %vm506_vm0, %v1012_v15, 0.0  ;;  %1031 = vpow2.f32 %v492_v52  ;;  %v496_v26 = vmul.f32 1.442695, %v373_v45 }
  0xba   :  { %v1020_v49 = vpop.eup %1019  ;;  %v561_v12 = vadd.f32 %v560_v23, %v559_v18  ;;  %v610_v24 = vadd.f32 %v609_v30, %v608_v55  ;;  %v376_v41 = vmul.f32 %v1944_v46, %v310_v20  ;;  %v564_v37 = vsel %vm506_vm0, %v1014_v3, 0.0 }
  0xbb   :  { %v1022_v19 = vpop.eup %1021  ;;  %v613_v31 = vsel %vm506_vm0, %v1016_v14, 0.0  ;;  %1033 = vpow2.f32 %v494_v2  ;;  %v498_v36 = vmul.f32 1.442695, %v374_v59  ;;  %v377_v38 = vmul.f32 %v1944_v46, %v312_v4 }
  0xbc   :  { %v1024_v39 = vpop.eup %1023  ;;  %v563_v13 = vadd.f32 %v562_v60, %v561_v12  ;;  %v612_v35 = vadd.f32 %v611_v43, %v610_v24  ;;  %v566_v29 = vsel %vm506_vm0, %v1018_v62, 0.0  ;;  %v615_v10 = vsel %vm506_vm0, %v1020_v49, 0.0 }
  0xbd   :  { %v1026_v21 = vpop.eup %1025  ;;  %1035 = vpow2.f32 %v496_v26  ;;  %v500_v27 = vmul.f32 1.442695, %v375_v7  ;;  %v568_v0 = vsel %vm506_vm0, %v1022_v19, 0.0  ;;  %v617_v5 = vsel %vm506_vm0, %v1024_v39, 0.0 }
  0xbe   :  { %v565_v16 = vadd.f32 %v564_v37, %v563_v13  ;;  %v614_v50 = vadd.f32 %v613_v31, %v612_v35  ;;  %1037 = vpow2.f32 %v498_v36  ;;  %v502_v32 = vmul.f32 1.442695, %v376_v41 }
  0xbf   :  { %v1028_v17 = vpop.eup %1027  ;;  %v619_v46 = vsel %vm506_vm0, %v1026_v21, 0.0  ;;  %1039 = vpow2.f32 %v500_v27  ;;  %v504_v9 = vmul.f32 1.442695, %v377_v38  ;;  %v655_v39 = vstv %s778_s0 }
  0xc0   :  { %v567_v33 = vadd.f32 %v566_v29, %v565_v16  ;;  %v616_v47 = vadd.f32 %v615_v10, %v614_v50  ;;  %v621_v8 = vsel %vm506_vm0, %v1028_v17, 0.0  ;;  %1041 = vpow2.f32 %v502_v32  ;;  %v767_v50 = vld [vmem:[#allocation8] ss:$0 sm:$0xff] }
  0xc1   :  { %v1030_v44 = vpop.eup %1029  ;;  %1043 = vpow2.f32 %v504_v9 }
  0xc2   :  { %v569_v1 = vadd.f32 %v568_v0, %v567_v33  ;;  %v618_v48 = vadd.f32 %v617_v5, %v616_v47  ;;  %v623_v42 = vsel %vm506_vm0, %v1030_v44, 0.0 }
  0xc3   :  { %v1032_v63 = vpop.eup %1031 }
  0xc4   :  { %v570_v53 = vrot.slane %v569_v1, 4  ;;  %v620_v22 = vadd.f32 %v619_v46, %v618_v48  ;;  %v625_v51 = vsel %vm506_vm0, %v1032_v63, 0.0 }
  0xc5   :  { %v1034_v28 = vpop.eup %1033 }
  0xc6   :  { %v571_v61 = vadd.f32 %v570_v53, %v569_v1  ;;  %v622_v57 = vadd.f32 %v621_v8, %v620_v22  ;;  %v627_v58 = vsel %vm506_vm0, %v1034_v28, 0.0 }
  0xc7   :  { %v1036_v34 = vpop.eup %1035 }
  0xc8   :  { %v572_v56 = vrot.slane %v571_v61, 2  ;;  %v624_v54 = vadd.f32 %v623_v42, %v622_v57  ;;  %v1038_v45 = vpop.eup %1037  ;;  %v629_v6 = vsel %vm506_vm0, %v1036_v34, 0.0 }
  0xc9   :  { %v1040_v15 = vpop.eup %1039  ;;  %v631_v40 = vsel %vm506_vm0, %v1038_v45, 0.0 }
  0xca   :  { %v626_v11 = vadd.f32 %v625_v51, %v624_v54  ;;  %v573_v52 = vadd.f32 %v572_v56, %v571_v61  ;;  %v1042_v3 = vpop.eup %1041  ;;  %v633_v59 = vsel %vm506_vm0, %v1040_v15, 0.0 }
  0xcb   :  { %v1044_v23 = vpop.eup %1043  ;;  %v635_v2 = vsel %vm506_vm0, %v1042_v3, 0.0 }
  0xcc   :  { %v628_v25 = vadd.f32 %v627_v58, %v626_v11  ;;  %v574_v30 = vrot.slane %v573_v52, 1  ;;  %v637_v55 = vsel %vm506_vm0, %v1044_v23, 0.0 }
  0xce   :  { %v630_v20 = vadd.f32 %v629_v6, %v628_v25  ;;  %v575_v62 = vadd.f32 %v574_v30, %v573_v52 }
  0xd0   :  { %v632_v14 = vadd.f32 %v631_v40, %v630_v20  ;;  %v646_v43 = vmul.f32 0.00390625, %v575_v62 }
  0xd2   :  { %v634_v18 = vadd.f32 %v633_v59, %v632_v14  ;;  %1045 = vlog2.f32 %v646_v43 }
  0xd4   :  { %v636_v4 = vadd.f32 %v635_v2, %v634_v18 }
  0xd6   :  { %v638_v7 = vadd.f32 %v637_v55, %v636_v4 }
  0xd8   :  { %v639_v60 = vrot.slane %v638_v7, 4 }
  0xda   :  { %v640_v49 = vadd.f32 %v639_v60, %v638_v7 }
  0xdc   :  { %v641_v26 = vrot.slane %v640_v49, 2  ;;  %v1046_v37 = vpop.eup %1045 }
  0xdd   :  { %v652_v31 = vmul.f32 0.6931472, %v1046_v37 }
  0xde   :  { %v642_v12 = vadd.f32 %v641_v26, %v640_v49 }
  0xdf   :  { %v656_v36 = vmul.f32 %v655_v39, %v652_v31 }
  0xe0   :  { %v643_v24 = vrot.slane %v642_v12, 1 }
  0xe1   :  { %v658_v38 = vmul.f32 1.442695, %v656_v36 }
  0xe2   :  { %v644_v19 = vadd.f32 %v643_v24, %v642_v12 }
  0xe4   :  { %v647_v41 = vmul.f32 0.00390625, %v644_v19 }
  0xe6   :  { %1047 = vlog2.f32 %v647_v41 }
  0xe7   :  { %1049 = vpow2.f32 %v658_v38 }
  0xf0   :  { %v1048_v13 = vpop.eup %1047 }
  0xf1   :  { %v654_v35 = vmul.f32 0.6931472, %v1048_v13  ;;  %v1050_v21 = vpop.eup %1049 }
  0xf3   :  { %v657_v29 = vmul.f32 %v655_v39, %v654_v35 }
  0xf5   :  { %v660_v10 = vmul.f32 1.442695, %v657_v29 }
  0xf7   :  { %1051 = vpow2.f32 %v660_v10 }
 0x101   :  { %v1052_v27 = vpop.eup %1051 }
 0x102   :  { %v673_v16 = vsel %vm672_vm3, %v1052_v27, %v1050_v21 }
 0x103   :  { %775 = vmatmul.mubr.msk.f32.vlgmr.msra.gmra.mrb[0].mxu0 %vm506_vm0, %v673_v16 }
 0x1d6   :  { %v746_v0 = vpop.f32.mrb[0].mxu0 }
 0x1d7   :  { %v747_v5 = vadd.f32 %v767_v50, %v746_v0  ;;  %v776_v17 = vpop.f32.mrb[1].mxu0 }
 0x1d9   :  { %750 = vst [vmem:[#allocation9] sm:$0x3] %v747_v5 }
 0x1da   :  { %1130 = shalt.err (!%p1127_p0)
}
 0x1db   :  { %s1131_s6 = scalar_lea.hbm %s1924_s4, 32 }
 0x1dc   :  { %p1132_p1 = scmp.ne.s32.totalorder %s1924_s4, %s1131_s6  ;;  %p1135_p2 = scmp.lt.u32.totalorder %s1131_s6, %s1924_s4 }
 0x1de   :  { %p1137_p3 = pnand %p1135_p2, %p1132_p1 }
 0x1e0   :  { %1140 = shalt.err (!%p1137_p3)
}
 0x1e1   :  { %760 = dma.vmem_to_hbm [thread:$0]  %s758_s28, 32, %s1924_s4, [#allocation5]  }
 0x1e2   :  { %1145 = dma.done.wait [#allocation5], 32  }
 0x1e3   :  { %1146 = vsyncadd [#allocation5], 4294967264 }
 0x1e4   :  { %764 = vsyncpa [#allocation4], 1 }
 0x1e5   :  { %765 = vsyncpa [#allocation7], 1 }
 0x1e6   :  { %766 = vsyncpa [#allocation5], 1 }

</bundles_post_ra>
